<compile_context>
chip_gen: v7x
topology: tpu7x:2x2x1
jax: 0.10.0
libtpu: 0.0.40
codegen_flags: <defaults>
</compile_context>

<pallas_src>
import functools

import jax
import jax.numpy as jnp
from jax.experimental import pallas as pl
from jax.experimental.pallas import tpu as pltpu


def _round_up(x, m):
    return ((x + m - 1) // m) * m


# ------------------------- GCN layer kernel ----------------------------------
def gcn_layer_kernel(adj_ref, xin_ref, w_ref, b_ref, out_ref, acc_ref):
    """out[i] = ReLU( (sum_k Â[i,k] @ Xin[k]) @ W + b ), accumulated in f32."""
    k = pl.program_id(1)

    @pl.when(k == 0)
    def _():
        acc_ref[...] = jnp.zeros_like(acc_ref)

    acc_ref[...] += jnp.dot(adj_ref[...], xin_ref[...],
                            preferred_element_type=jnp.float32)

    @pl.when(k == pl.num_programs(1) - 1)
    def _():
        h = jnp.dot(acc_ref[...].astype(jnp.bfloat16), w_ref[...],
                    preferred_element_type=jnp.float32)
        h = h + b_ref[...]                      # f32 bias add
        out_ref[...] = jnp.maximum(h, 0.0).astype(out_ref.dtype)


def gcn_layer(adj, xin, w, b, *, tm):
    """adj: [Np,Np] bf16, xin: [Np,Fin] bf16, w: [Fin,Hp] bf16, b: [1,Hp] f32."""
    np_, _ = adj.shape
    fin = xin.shape[1]
    hp = w.shape[1]
    tk = tm
    grid = (np_ // tm, np_ // tk)
    return pl.pallas_call(
        gcn_layer_kernel,
        out_shape=jax.ShapeDtypeStruct((np_, hp), jnp.bfloat16),
        grid_spec=pltpu.PrefetchScalarGridSpec(
            num_scalar_prefetch=0,
            grid=grid,
            in_specs=[
                pl.BlockSpec((tm, tk), lambda i, k: (i, k)),     # Â tile
                pl.BlockSpec((tk, fin), lambda i, k: (k, 0)),    # Xin k-tile
                pl.BlockSpec((fin, hp), lambda i, k: (0, 0)),    # W (resident)
                pl.BlockSpec((1, hp), lambda i, k: (0, 0)),      # bias
            ],
            out_specs=pl.BlockSpec((tm, hp), lambda i, k: (i, 0)),
            scratch_shapes=[pltpu.VMEM((tm, fin), jnp.float32)],
        ),
        compiler_params=pltpu.CompilerParams(
            dimension_semantics=("parallel", "arbitrary"),
            vmem_limit_bytes=32 * 1024 * 1024,
        ),
    )(adj, xin, w, b)


# -------------------- fused mean-pool + Linear kernel -------------------------
def pool_fc_kernel(h_ref, wfc_ref, bfc_ref, out_ref, acc_ref, *, num_nodes, tm):
    i = pl.program_id(0)

    @pl.when(i == 0)
    def _():
        acc_ref[...] = jnp.zeros_like(acc_ref)

    # Mask out padded node rows (they hold ReLU(bias), not real data).
    rows = jax.lax.broadcasted_iota(jnp.int32, h_ref.shape, 0) + i * tm
    h = jnp.where(rows < num_nodes, h_ref[...].astype(jnp.float32), 0.0)
    acc_ref[...] += jnp.sum(h, axis=0, keepdims=True)           # [1, Hp]

    @pl.when(i == pl.num_programs(0) - 1)
    def _():
        pooled = acc_ref[...] * (1.0 / num_nodes)               # mean over nodes
        out = jnp.dot(pooled.astype(jnp.bfloat16), wfc_ref[...],
                      preferred_element_type=jnp.float32) + bfc_ref[...]
        out_ref[...] = out


def pool_fc(h, wfc, bfc, *, num_nodes, tm):
    np_, hp = h.shape
    op = wfc.shape[1]
    kernel = functools.partial(pool_fc_kernel, num_nodes=num_nodes, tm=tm)
    return pl.pallas_call(
        kernel,
        out_shape=jax.ShapeDtypeStruct((1, op), jnp.float32),
        grid_spec=pltpu.PrefetchScalarGridSpec(
            num_scalar_prefetch=0,
            grid=(np_ // tm,),
            in_specs=[
                pl.BlockSpec((tm, hp), lambda i: (i, 0)),
                pl.BlockSpec((hp, op), lambda i: (0, 0)),
                pl.BlockSpec((1, op), lambda i: (0, 0)),
            ],
            out_specs=pl.BlockSpec((1, op), lambda i: (0, 0)),
            scratch_shapes=[pltpu.VMEM((1, hp), jnp.float32)],
        ),
        compiler_params=pltpu.CompilerParams(
            dimension_semantics=("arbitrary",),
            vmem_limit_bytes=32 * 1024 * 1024,
        ),
    )(h, wfc, bfc)


# ------------------------------ forward wrapper -------------------------------
def gnn_forward(adj_norm, x, w1, b1, w2, b2, wfc, bfc):
    """Full GNN forward: two tiled GCN layers + fused mean-pool/Linear."""
    n, f_in = x.shape
    h = w1.shape[1]
    o = wfc.shape[1]

    # Node-tile size: lane/sublane friendly, capped for VMEM (works on v5e/v6e/v7x).
    tm = min(256, _round_up(n, 8))
    np_ = _round_up(n, tm)
    fp = _round_up(f_in, 128)
    hp = _round_up(h, 128)
    op = _round_up(o, 128)

    # Zero-padded, bf16 operands for the MXU (biases stay f32).
    adj_p = jnp.zeros((np_, np_), jnp.bfloat16).at[:n, :n].set(adj_norm.astype(jnp.bfloat16))
    x_p = jnp.zeros((np_, fp), jnp.bfloat16).at[:n, :f_in].set(x.astype(jnp.bfloat16))
    w1_p = jnp.zeros((fp, hp), jnp.bfloat16).at[:f_in, :h].set(w1.astype(jnp.bfloat16))
    b1_p = jnp.zeros((1, hp), jnp.float32).at[:, :h].set(b1)
    w2_p = jnp.zeros((hp, hp), jnp.bfloat16).at[:h, :h].set(w2.astype(jnp.bfloat16))
    b2_p = jnp.zeros((1, hp), jnp.float32).at[:, :h].set(b2)
    wfc_p = jnp.zeros((hp, op), jnp.bfloat16).at[:h, :o].set(wfc.astype(jnp.bfloat16))
    bfc_p = jnp.zeros((1, op), jnp.float32).at[:, :o].set(bfc)

    h1 = gcn_layer(adj_p, x_p, w1_p, b1_p, tm=tm)     # [Np, Hp] bf16
    h2 = gcn_layer(adj_p, h1, w2_p, b2_p, tm=tm)      # [Np, Hp] bf16
    out = pool_fc(h2, wfc_p, bfc_p, num_nodes=n, tm=tm)  # [1, Op] f32
    return out[0, :o]                                  # shape [output_dim]


# ------------------------------ JAX glue --------------------------------------
def build_gcn_adj(edge_index, num_nodes):
    """Dense Â = D^{-1/2}(A + I)D^{-1/2}; duplicate edges scatter-ADD (PyG semantics)."""
    src = edge_index[0]
    dst = edge_index[1]
    a = jnp.zeros((num_nodes, num_nodes), jnp.float32)
    a = a.at[dst, src].add(1.0)
    a = a + jnp.eye(num_nodes, dtype=jnp.float32)             # self loops
    deg = jnp.sum(a, axis=1)
    dinv = jnp.where(deg > 0, 1.0 / jnp.sqrt(deg), 0.0)
    return dinv[:, None] * a * dinv[None, :]


def init_params(key, input_dim, hidden_dim, output_dim):
    k1, k2, k3 = jax.random.split(key, 3)
    w1 = jax.random.normal(k1, (input_dim, hidden_dim), jnp.float32) / jnp.sqrt(input_dim)
    b1 = jnp.zeros((1, hidden_dim), jnp.float32)
    w2 = jax.random.normal(k2, (hidden_dim, hidden_dim), jnp.float32) / jnp.sqrt(hidden_dim)
    b2 = jnp.zeros((1, hidden_dim), jnp.float32)
    wfc = jax.random.normal(k3, (hidden_dim, output_dim), jnp.float32) / jnp.sqrt(hidden_dim)
    bfc = jnp.zeros((1, output_dim), jnp.float32)
    return w1, b1, w2, b2, wfc, bfc


if __name__ == "__main__":
    N, INPUT_DIM, HIDDEN_DIM, OUTPUT_DIM = 8, 4, 64, 1

    key = jax.random.PRNGKey(0)
    kx, ke, kp = jax.random.split(key, 3)

    # node features [N, input_dim]
    x = jax.random.normal(kx, (N, INPUT_DIM), jnp.float32)

    # random edge_index [2, E] (no self loops; Â adds them)
    E = 16
    src = jax.random.randint(ke, (E,), 0, N)
    dst = (src + 1 + jax.random.randint(jax.random.fold_in(ke, 1), (E,), 0, N - 1)) % N
    edge_index = jnp.stack([src, dst]).astype(jnp.int32)

    adj_norm = build_gcn_adj(edge_index, N)
    w1, b1, w2, b2, wfc, bfc = init_params(kp, INPUT_DIM, HIDDEN_DIM, OUTPUT_DIM)

    out = gnn_forward(adj_norm, x, w1, b1, w2, b2, wfc, bfc)
    out = jax.block_until_ready(out)

    # pure-JAX f32 reference (kernel uses bf16 MXU inputs -> loose tolerance)
    h_ref = jnp.maximum(adj_norm @ (x @ w1) + b1, 0.0)
    h_ref = jnp.maximum(adj_norm @ (h_ref @ w2) + b2, 0.0)
    ref = jnp.mean(h_ref, axis=0) @ wfc + bfc[0]
    assert out.shape == ref.shape, (out.shape, ref.shape)
    assert jnp.allclose(out, ref, atol=5e-2, rtol=5e-2), (out, ref)

    print("KERNEL_OK")
</pallas_src>

<mosaic_0001>
module attributes {stable_mosaic.version = 11 : i64} {
  func.func @gcn_layer_kernel(%arg0: i32, %arg1: i32, %arg2: memref<8x8xbf16, #tpu.memory_space<vmem>>, %arg3: memref<8x128xbf16, #tpu.memory_space<vmem>>, %arg4: memref<128x128xbf16, #tpu.memory_space<vmem>>, %arg5: memref<1x128xf32, #tpu.memory_space<vmem>>, %arg6: memref<8x128xbf16, #tpu.memory_space<vmem>>, %arg7: memref<8x128xf32, #tpu.memory_space<vmem>>) attributes {dimension_semantics = [#tpu.dimension_semantics<parallel>, #tpu.dimension_semantics<arbitrary>], iteration_bounds = array<i64: 1, 1>, scalar_prefetch = 0 : i64, scratch_operands = 1 : i64, tpu.core_type = #tpu.core_type<tc>, window_params = [{transform_indices = @transform_0, window_bounds = array<i64: 8, 8>}, {transform_indices = @transform_1, window_bounds = array<i64: 8, 128>}, {pipeline_mode = #tpu.pipeline_mode<synchronous>, transform_indices = @transform_2, window_bounds = array<i64: 128, 128>}, {pipeline_mode = #tpu.pipeline_mode<synchronous>, transform_indices = @transform_3, window_bounds = array<i64: 1, 128>}, {transform_indices = @transform_4, window_bounds = array<i64: 8, 128>}]} {
    %c0_i32 = arith.constant 0 : i32
    %0 = arith.cmpi eq, %arg1, %c0_i32 : i32
    %1 = arith.extui %0 : i1 to i32
    %c0_i32_0 = arith.constant 0 : i32
    %2 = arith.cmpi ne, %1, %c0_i32_0 : i32
    scf.if %2 {
      %cst_10 = arith.constant 0.000000e+00 : f32
      %12 = vector.broadcast %cst_10 : f32 to vector<8x128xf32>
      %c0_11 = arith.constant 0 : index
      %c0_12 = arith.constant 0 : index
      %13 = vector.load %arg7[%c0_11, %c0_12] : memref<8x128xf32, #tpu.memory_space<vmem>>, vector<8x128xf32>
      tpu.vector_store %arg7[%c0_11, %c0_12], %12 {strides = array<i32>} : memref<8x128xf32, #tpu.memory_space<vmem>>, vector<8x128xf32>,
    } else {
    }
    %c0 = arith.constant 0 : index
    %c0_1 = arith.constant 0 : index
    %3 = vector.load %arg7[%c0, %c0_1] : memref<8x128xf32, #tpu.memory_space<vmem>>, vector<8x128xf32>
    %c0_2 = arith.constant 0 : index
    %c0_3 = arith.constant 0 : index
    %4 = vector.load %arg2[%c0_2, %c0_3] : memref<8x8xbf16, #tpu.memory_space<vmem>>, vector<8x8xbf16>
    %c0_4 = arith.constant 0 : index
    %c0_5 = arith.constant 0 : index
    %5 = vector.load %arg3[%c0_4, %c0_5] : memref<8x128xbf16, #tpu.memory_space<vmem>>, vector<8x128xbf16>
    %cst = arith.constant dense<0.000000e+00> : vector<8x128xf32>
    %6 = tpu.matmul %4, %5, %cst {dimension_numbers = #tpu.dot_dimension_numbers<[1], [0], [0], [1], [0, 0, 1, 1], [], []>} : vector<8x8xbf16>, vector<8x128xbf16>, vector<8x128xf32> -> vector<8x128xf32>
    %7 = arith.addf %3, %6 : vector<8x128xf32>
    %c0_6 = arith.constant 0 : index
    %c0_7 = arith.constant 0 : index
    %8 = vector.load %arg7[%c0_6, %c0_7] : memref<8x128xf32, #tpu.memory_space<vmem>>, vector<8x128xf32>
    tpu.vector_store %arg7[%c0_6, %c0_7], %7 {strides = array<i32>} : memref<8x128xf32, #tpu.memory_space<vmem>>, vector<8x128xf32>,
    %c0_i32_8 = arith.constant 0 : i32
    %9 = arith.cmpi eq, %arg1, %c0_i32_8 : i32
    %10 = arith.extui %9 : i1 to i32
    %c0_i32_9 = arith.constant 0 : i32
    %11 = arith.cmpi ne, %10, %c0_i32_9 : i32
    scf.if %11 {
      %c0_10 = arith.constant 0 : index
      %c0_11 = arith.constant 0 : index
      %12 = vector.load %arg7[%c0_10, %c0_11] : memref<8x128xf32, #tpu.memory_space<vmem>>, vector<8x128xf32>
      %13 = arith.truncf %12 : vector<8x128xf32> to vector<8x128xbf16>
      %c0_12 = arith.constant 0 : index
      %c0_13 = arith.constant 0 : index
      %14 = vector.load %arg4[%c0_12, %c0_13] : memref<128x128xbf16, #tpu.memory_space<vmem>>, vector<128x128xbf16>
      %cst_14 = arith.constant dense<0.000000e+00> : vector<8x128xf32>
      %15 = tpu.matmul %13, %14, %cst_14 {dimension_numbers = #tpu.dot_dimension_numbers<[1], [0], [0], [1], [0, 0, 1, 1], [], []>} : vector<8x128xbf16>, vector<128x128xbf16>, vector<8x128xf32> -> vector<8x128xf32>
      %c0_15 = arith.constant 0 : index
      %c0_16 = arith.constant 0 : index
      %16 = vector.load %arg5[%c0_15, %c0_16] : memref<1x128xf32, #tpu.memory_space<vmem>>, vector<1x128xf32>
      %17 = vector.broadcast %16 : vector<1x128xf32> to vector<8x128xf32>
      %18 = arith.addf %15, %17 : vector<8x128xf32>
      %cst_17 = arith.constant 0.000000e+00 : f32
      %19 = vector.broadcast %cst_17 : f32 to vector<8x128xf32>
      %20 = arith.maximumf %18, %19 : vector<8x128xf32>
      %21 = arith.truncf %20 : vector<8x128xf32> to vector<8x128xbf16>
      %c0_18 = arith.constant 0 : index
      %c0_19 = arith.constant 0 : index
      %22 = vector.load %arg6[%c0_18, %c0_19] : memref<8x128xbf16, #tpu.memory_space<vmem>>, vector<8x128xbf16>
      tpu.vector_store %arg6[%c0_18, %c0_19], %21 {strides = array<i32>} : memref<8x128xbf16, #tpu.memory_space<vmem>>, vector<8x128xbf16>,
    } else {
    }
    return
  }
  func.func @transform_0(%arg0: i32, %arg1: i32) -> (i32, i32) {
    %c0_i32 = arith.constant 0 : i32
    return %arg0, %arg1 : i32, i32
  }
  func.func @transform_1(%arg0: i32, %arg1: i32) -> (i32, i32) {
    %c0_i32 = arith.constant 0 : i32
    %c0_i32_0 = arith.constant 0 : i32
    return %arg1, %c0_i32 : i32, i32
  }
  func.func @transform_2(%arg0: i32, %arg1: i32) -> (i32, i32) {
    %c0_i32 = arith.constant 0 : i32
    %c0_i32_0 = arith.constant 0 : i32
    %c0_i32_1 = arith.constant 0 : i32
    return %c0_i32, %c0_i32_0 : i32, i32
  }
  func.func @transform_3(%arg0: i32, %arg1: i32) -> (i32, i32) {
    %c0_i32 = arith.constant 0 : i32
    %c0_i32_0 = arith.constant 0 : i32
    %c0_i32_1 = arith.constant 0 : i32
    return %c0_i32, %c0_i32_0 : i32, i32
  }
  func.func @transform_4(%arg0: i32, %arg1: i32) -> (i32, i32) {
    %c0_i32 = arith.constant 0 : i32
    %c0_i32_0 = arith.constant 0 : i32
    return %arg0, %c0_i32 : i32, i32
  }
}

</mosaic_0001>

<bundles_post_ra>
// kernel: tpu_custom_call.1
= control target key start
LH: loop header
LB: loop body
LE: loop exit
PB: predicated region body
PF: predicated region fallthrough
CT: control target
= control target key end

     0   :  { %9 = vsyncpa [#allocation4], 0  ;;  %s490_s0 = inlined_call_operand.hbm [shape: bf16[8,8], index: 0, kind: input, shape index: {}]   ;;  %s491_s1 = inlined_call_operand.hbm [shape: bf16[8,128], index: 1, kind: input, shape index: {}]   ;;  %s492_s2 = inlined_call_operand.hbm [shape: bf16[128,128], index: 2, kind: input, shape index: {}]   ;;  %s493_s3 = inlined_call_operand.vmem [shape: f32[1,128], index: 3, kind: input, shape index: {}]   ;;  %s494_s4 = inlined_call_operand.hbm [shape: bf16[8,128], index: 4, kind: output, shape index: {}]  }
   0x1   :  { %10 = vsyncpa [#allocation7], 0 }
   0x2   :  { %11 = vsyncpa [#allocation5], 0  ;;  %s406_s15 = smov [#allocation6]   ;;  %s407_s17 = smov [#allocation3]  }
   0x3   :  { %s28_s16 = sshll.u32 %s406_s15, 4  ;;  %s18_s18 = sshll.u32 %s407_s17, 4  ;;  %s29_s16 = int_to_ptr.vmem [resolvable:$true] %s28_s16  ;;  %s19_s18 = int_to_ptr.vmem [resolvable:$true] %s18_s18 }
   0x4   :  { %s312_s21 = scalar_lea.hbm %s491_s1, 64 }
   0x5   :  { %p313_p0 = scmp.ne.s32.totalorder %s491_s1, %s312_s21  ;;  %p316_p1 = scmp.lt.u32.totalorder %s312_s21, %s491_s1 }
   0x7   :  { %p318_p2 = pnand %p316_p1, %p313_p0 }
   0x9   :  { %321 = shalt.err (!%p318_p2)
}
   0xa   :  { %s322_s26 = scalar_lea.vmem %s29_s16, 64  ;;  %p327_p4 = scmp.lt.s32.totalorder %s29_s16, %s29_s16 }
   0xb   :  { %p323_p3 = scmp.ne.s32.totalorder %s29_s16, %s322_s26  ;;  %p328_p5 = scmp.lt.s32.totalorder %s322_s26, %s322_s26 }
   0xd   :  { %p329_p6 = por %p328_p5, %p327_p4 }
   0xf   :  { %p330_p7 = pnand %p329_p6, %p323_p3 }
  0x11   :  { %333 = shalt.err (!%p330_p7)
}
  0x12   :  { %31 = dma.hbm_to_vmem [thread:$0]  %s491_s1, 64, %s29_s16, [#allocation7]  }
  0x13   :  { %s334_s5 = scalar_lea.hbm %s490_s0, 64 }
  0x14   :  { %p335_p8 = scmp.ne.s32.totalorder %s490_s0, %s334_s5  ;;  %p338_p9 = scmp.lt.u32.totalorder %s334_s5, %s490_s0 }
  0x16   :  { %p340_p10 = pnand %p338_p9, %p335_p8 }
  0x18   :  { %343 = shalt.err (!%p340_p10)
}
  0x19   :  { %s344_s10 = scalar_lea.vmem %s19_s18, 64  ;;  %p349_p12 = scmp.lt.s32.totalorder %s19_s18, %s19_s18 }
  0x1a   :  { %p345_p11 = scmp.ne.s32.totalorder %s19_s18, %s344_s10  ;;  %p350_p13 = scmp.lt.s32.totalorder %s344_s10, %s344_s10 }
  0x1c   :  { %p351_p0 = por %p350_p13, %p349_p12 }
  0x1e   :  { %p352_p1 = pnand %p351_p0, %p345_p11 }
  0x20   :  { %355 = shalt.err (!%p352_p1)
}
  0x21   :  { %21 = dma.hbm_to_vmem [thread:$0]  %s490_s0, 64, %s19_s18, [#allocation4]  }
  0x22   :  { %s408_s12 = smov [#allocation8]   ;;  %s356_s16 = scalar_lea.hbm %s492_s2, 1024 }
  0x23   :  { %s37_s13 = sshll.u32 %s408_s12, 4  ;;  %p357_p2 = scmp.ne.s32.totalorder %s492_s2, %s356_s16  ;;  %s38_s13 = int_to_ptr.vmem [resolvable:$true] %s37_s13 }
  0x24   :  { %p360_p3 = scmp.lt.u32.totalorder %s356_s16, %s492_s2 }
  0x26   :  { %p362_p4 = pnand %p360_p3, %p357_p2 }
  0x28   :  { %365 = shalt.err (!%p362_p4)
}
  0x29   :  { %s366_s22 = scalar_lea.vmem %s38_s13, 1024  ;;  %p371_p6 = scmp.lt.s32.totalorder %s38_s13, %s38_s13 }
  0x2a   :  { %p367_p5 = scmp.ne.s32.totalorder %s38_s13, %s366_s22  ;;  %p372_p7 = scmp.lt.s32.totalorder %s366_s22, %s366_s22 }
  0x2c   :  { %p373_p8 = por %p372_p7, %p371_p6 }
  0x2e   :  { %p374_p9 = pnand %p373_p8, %p367_p5 }
  0x30   :  { %377 = shalt.err (!%p374_p9)
}
  0x31   :  { %s409_s0 = smov 64   ;;  %s410_s18 = smov 4  }
  0x32   :  { %43 = dma.hbm_to_vmem [thread:$0]  %s492_s2, 1024, %s38_s13, [#allocation7], %s409_s0, %s409_s0, %s410_s18  }
  0x33   :  { %400 = dma.done.wait [#allocation4], 64  }
  0x34   :  { %401 = vsyncadd [#allocation4], 4294967232 }
  0x35   :  { %402 = dma.done.wait [#allocation7], 1088  }
  0x36   :  { %403 = vsyncadd [#allocation7], 4294966208  ;;  %v411_v0 = vmov 0.0   ;;  %vm412_vm0 = vmmov 0   ;;  %vm68_vm1 = vcmask 1043456   ;;  %vm64_vm2 = vcmask 64512  }
  0x37   :  { %270 = vmatprep.subr.bf16.mxu0 %v411_v0  ;;  %272 = vmatprep.mubr.msk.bf16.mxu0 %vm412_vm0, %v411_v0  ;;  %v63_v1 = vld [vmem:[#allocation6] sm:$0xf]  ;;  %v304_v3 = vld [vmem:[#allocation8] sm:$0xff]   ;;  %v62_v4 = vld [vmem:[#allocation3] sm:$0xf]  ;;  %s413_s26 = smov [#allocation9]  }
  0x38   :  { %276 = vmatprep.subr.bf16.mxu1 %v411_v0  ;;  %292 = vmatprep.mubr.msk.bf16.mxu1 %vm412_vm0, %v411_v0  ;;  %v70_v2 = vsel %vm68_vm1, %v63_v1, 0  ;;  %v305_v5 = vld [vmem:[#allocation8 + $0x8] sm:$0xff]   ;;  %v306_v6 = vld [vmem:[#allocation8 + $0x10] sm:$0xff]   ;;  %v307_v7 = vld [vmem:[#allocation8 + $0x18] sm:$0xff]   ;;  %s239_s27 = sshll.u32 %s413_s26, 4  ;;  %s240_s27 = int_to_ptr.vmem [resolvable:$true] %s239_s27 }
  0x39   :  { %271 = vmatpush3.bf16.msra.mxu0 %v70_v2  ;;  %277 = vmatpush3.bf16.msra.mxu1 %v304_v3  ;;  %v308_v8 = vld [vmem:[#allocation8 + $0x20] sm:$0xff]   ;;  %v309_v9 = vld [vmem:[#allocation8 + $0x28] sm:$0xff]   ;;  %v310_v10 = vld [vmem:[#allocation8 + $0x30] sm:$0xff]   ;;  %s378_s28 = scalar_lea.vmem %s240_s27, 64  ;;  %p383_p11 = scmp.lt.s32.totalorder %s240_s27, %s240_s27 }
  0x3a   :  { %278 = vmatprep.subr.bf16.mxu1 %v411_v0  ;;  %v311_v11 = vld [vmem:[#allocation8 + $0x38] sm:$0xff]   ;;  %p379_p10 = scmp.ne.s32.totalorder %s240_s27, %s378_s28  ;;  %p384_p12 = scmp.lt.s32.totalorder %s378_s28, %s378_s28 }
  0x3b   :  { %v250_v17 = vld [vmem:[%s493_s3] ss:$0 sm:$0xff] }
  0x3c   :  { %273 = vmatmul.mubr.msk.bf16.vlgmr.msra.gmra.mrb[0].mxu0 %vm64_vm2, %v62_v4  ;;  %p385_p13 = por %p384_p12, %p383_p11 }
  0x3d   :  { %279 = vmatpush3.bf16.msra.mxu1 %v305_v5 }
  0x3e   :  { %280 = vmatprep.subr.bf16.mxu1 %v411_v0  ;;  %p386_p0 = pnand %p385_p13, %p379_p10 }
  0x41   :  { %281 = vmatpush3.bf16.msra.mxu1 %v306_v6 }
  0x42   :  { %282 = vmatprep.subr.bf16.mxu1 %v411_v0 }
  0x45   :  { %283 = vmatpush3.bf16.msra.mxu1 %v307_v7 }
  0x46   :  { %284 = vmatprep.subr.bf16.mxu1 %v411_v0 }
  0x49   :  { %285 = vmatpush3.bf16.msra.mxu1 %v308_v8 }
  0x4a   :  { %286 = vmatprep.subr.bf16.mxu1 %v411_v0 }
  0x4d   :  { %287 = vmatpush3.bf16.msra.mxu1 %v309_v9 }
  0x4e   :  { %288 = vmatprep.subr.bf16.mxu1 %v411_v0 }
  0x51   :  { %289 = vmatpush3.bf16.msra.mxu1 %v310_v10 }
  0x52   :  { %290 = vmatprep.subr.bf16.mxu1 %v411_v0 }
  0x55   :  { %291 = vmatpush3.bf16.msra.mxu1 %v311_v11 }
 0x10f   :  { %v106_v12 = vpop.f32.mrb[0].mxu0 }
 0x110   :  { %v118_v13 = vpack.c.bf16 %v106_v12, %v106_v12  ;;  %v274_v14 = vpop.f32.mrb[1].mxu0 }
 0x111   :  { %v109_v15 = vpop.f32.mrb[2].mxu0 }
 0x112   :  { %v275_v16 = vpop.f32.mrb[3].mxu0  ;;  %293 = vmatmul.mubr.bf16.vlgmr.msra.gmra.mrb[0].mxu1 %v118_v13 }
 0x1e5   :  { %v224_v18 = vpop.f32.mrb[0].mxu1 }
 0x1e6   :  { %v225_v19 = vadd.f32 %v250_v17, %v224_v18  ;;  %v294_v20 = vpop.f32.mrb[1].mxu1 }
 0x1e7   :  { %v227_v21 = vpop.f32.mrb[2].mxu1 }
 0x1e8   :  { %v230_v22 = vmax.f32 %v225_v19, 0.0  ;;  %v295_v23 = vpop.f32.mrb[3].mxu1 }
 0x1ea   :  { %v231_v24 = vpack.c.bf16 %v230_v22, %v230_v22 }
 0x1ec   :  { %232 = vst [vmem:[#allocation9] sm:$0xf] %v231_v24 }
 0x1ed   :  { %389 = shalt.err (!%p386_p0)
}
 0x1ee   :  { %s390_s30 = scalar_lea.hbm %s494_s4, 64 }
 0x1ef   :  { %p391_p1 = scmp.ne.s32.totalorder %s494_s4, %s390_s30  ;;  %p394_p2 = scmp.lt.u32.totalorder %s390_s30, %s494_s4 }
 0x1f1   :  { %p396_p3 = pnand %p394_p2, %p391_p1 }
 0x1f3   :  { %399 = shalt.err (!%p396_p3)
}
 0x1f4   :  { %242 = dma.vmem_to_hbm [thread:$0]  %s240_s27, 64, %s494_s4, [#allocation5]  }
 0x1f5   :  { %404 = dma.done.wait [#allocation5], 64  }
 0x1f6   :  { %405 = vsyncadd [#allocation5], 4294967232 }
 0x1f7   :  { %246 = vsyncpa [#allocation4], 1 }
 0x1f8   :  { %247 = vsyncpa [#allocation7], 1 }
 0x1f9   :  { %248 = vsyncpa [#allocation5], 1 }

</bundles_post_ra>
